<compile_context>
chip_gen: v5e
topology: v5e:2x2
jax: 0.10.0
libtpu: 0.0.40
codegen_flags: <defaults>
</compile_context>

<pallas_src>
import functools

import jax
import jax.numpy as jnp
from jax.experimental import pallas as pl
from jax.experimental.pallas import tpu as pltpu

LANES = 128
SUBLANES = 8
TARGET_BLOCK_BYTES = 4 * 1024 * 1024   # HBM bytes per input per grid step (native dtype)
MAX_TILE_ROWS = 16 * 1024              # hard cap (bounds in-kernel f32 temporaries)
VMEM_LIMIT_BYTES = 48 * 1024 * 1024    # fits v7x 64 MiB physical VMEM with headroom
MIN_PALLAS_ELEMENTS = 1 << 20          # below this, plain XLA reduction is faster


def _round_up(x, m):
    return ((x + m - 1) // m) * m


def _num_tensorcores():
    """Best-effort TensorCores-per-chip (2 on v7x, 1 on v5e/v6e)."""
    try:
        info = pltpu.get_tpu_info()
        for name in ("num_tensorcores", "tensorcore_count", "num_cores",
                     "core_count", "cores_per_chip", "num_cores_per_chip"):
            v = getattr(info, name, None)
            if v is not None:
                v = int(v)
                if v > 0:
                    return max(1, min(v, 4))
    except Exception:
        pass
    try:
        v = getattr(jax.local_devices()[0], "num_cores", None)
        if v is not None:
            v = int(v)
            if v > 0:
                return max(1, min(v, 4))
    except Exception:
        pass
    # Unknown hardware: default to 2. Costs at most one masked dead tile and a
    # second tiny accumulator slab on 1-TC parts; keeps both v7x cores fed.
    return 2


def _mse_partial_kernel(p_ref, g_ref, o_ref, *, tile_rows, valid_rows,
                        full_tiles, needs_mask):
    """Accumulate sum((p - g)^2) into a vreg-shaped (8, 128) slab per chunk."""
    c = pl.program_id(0)            # "parallel" chunk axis
    s = pl.program_id(1)            # "arbitrary" reduction axis
    steps = pl.num_programs(1)

    @pl.when(s == 0)
    def _init():
        o_ref[...] = jnp.zeros_like(o_ref)

    def _accumulate(mask_rows):
        d = p_ref[...].astype(jnp.float32) - g_ref[...].astype(jnp.float32)
        sq = d * d
        if mask_rows:
            # Zero rows beyond the valid row count (ragged tail / grid
            # rounding); OOB garbage (even NaN/Inf) is dropped by the select.
            r0 = (c * steps + s) * tile_rows
            rid = r0 + jax.lax.broadcasted_iota(jnp.int32, sq.shape, 0)
            sq = jnp.where(rid < valid_rows, sq, 0.0)
        # Fold (tile_rows, 128) into the (8, 128) accumulator with pure VPU
        # adds; the cross-lane/sublane reduce is deferred to the JAX wrapper.
        o_ref[...] += jnp.sum(sq.reshape(-1, SUBLANES, LANES), axis=0)

    if not needs_mask:
        _accumulate(False)
    else:
        t = c * steps + s

        @pl.when(t < full_tiles)      # hot path: fully-valid tiles, no mask
        def _full():
            _accumulate(False)

        @pl.when(t >= full_tiles)     # boundary / grid-rounding tiles
        def _tail():
            _accumulate(True)


def mse_loss(predict_y, gt_y, *, min_pallas_elements=MIN_PALLAS_ELEMENTS):
    """Pallas TPU implementation of torch.mean((predict_y - gt_y) ** 2)."""
    assert predict_y.shape == gt_y.shape, "shapes must match (no broadcasting)"
    n_elem = predict_y.size
    if n_elem == 0:
        return jnp.float32(jnp.nan)

    # Tiny inputs: launch + single-step pipeline overhead dominates; XLA's
    # fused reduction is faster and avoids all reshape plumbing.
    if n_elem < min_pallas_elements:
        d = predict_y.astype(jnp.float32) - gt_y.astype(jnp.float32)
        return jnp.mean(d * d)

    p_flat = predict_y.reshape(-1)
    g_flat = gt_y.reshape(-1)

    # Lane-dense (rows, 128) slab in NATIVE dtype (cast happens in-register in
    # the kernel).  When n_elem % 128 == 0 (common NN case) this is copy-free.
    if n_elem % LANES == 0:
        rows = n_elem // LANES
    else:
        # TODO(synk): a <128-element tail forces a minimal pad-to-128 copy;
        # avoiding it entirely would need manual 1-D HBM DMA, not worth it.
        padded = _round_up(n_elem, LANES)
        p_flat = jnp.pad(p_flat, (0, padded - n_elem))
        g_flat = jnp.pad(g_flat, (0, padded - n_elem))
        rows = padded // LANES

    p2d = p_flat.reshape(rows, LANES)
    g2d = g_flat.reshape(rows, LANES)

    # Tile sized by HBM bytes per step (not rows): bf16 gets 2x the rows of
    # f32, int8 4x, for the same DMA traffic per grid step.
    itemsize = jnp.dtype(predict_y.dtype).itemsize
    tile_rows = max(SUBLANES, TARGET_BLOCK_BYTES // (LANES * itemsize))
    tile_rows = min(tile_rows, MAX_TILE_ROWS, _round_up(rows, SUBLANES))
    tile_rows = _round_up(tile_rows, SUBLANES)

    tiles_needed = pl.cdiv(rows, tile_rows)
    num_chunks = max(1, min(_num_tensorcores(), tiles_needed))
    steps = pl.cdiv(tiles_needed, num_chunks)
    grid_rows = num_chunks * steps * tile_rows
    needs_mask = grid_rows != rows          # ragged tail and/or grid rounding
    full_tiles = rows // tile_rows          # tiles fully inside valid data

    def in_map(c, s):
        # Clamp grid-rounding overshoot onto the last real tile; its (re-read)
        # contribution is masked to zero inside the kernel.
        return (jnp.minimum(c * steps + s, tiles_needed - 1), 0)

    kernel = functools.partial(
        _mse_partial_kernel,
        tile_rows=tile_rows, valid_rows=rows,
        full_tiles=full_tiles, needs_mask=needs_mask)

    partials = pl.pallas_call(
        kernel,
        out_shape=jax.ShapeDtypeStruct((num_chunks, SUBLANES, LANES), jnp.float32),
        grid_spec=pltpu.PrefetchScalarGridSpec(
            num_scalar_prefetch=0,
            grid=(num_chunks, steps),
            in_specs=[
                pl.BlockSpec((tile_rows, LANES), in_map),
                pl.BlockSpec((tile_rows, LANES), in_map),
            ],
            # Output block is constant across the reduction axis -> it is the
            # VMEM-resident accumulator (no scratch, no finalize copy).
            out_specs=pl.BlockSpec((None, SUBLANES, LANES), lambda c, s: (c, 0, 0)),
        ),
        compiler_params=pltpu.CompilerParams(
            # TODO(synk): on v7x verify in xprof that both TensorCores take
            # chunks; if one is idle, switch the leading axis to CORE_PARALLEL.
            dimension_semantics=("parallel", "arbitrary"),
            vmem_limit_bytes=VMEM_LIMIT_BYTES,
        ),
    )(p2d, g2d)

    # Tiny final cross-lane combine (num_chunks * 8 * 128 elems) + mean.
    return jnp.sum(partials) / n_elem


if __name__ == "__main__":
    root = jax.random.PRNGKey(0)

    def run_case(key, shape, force_kernel, rtol):
        k1, k2 = jax.random.split(key)
        p = jax.random.normal(k1, shape, dtype=jnp.float32)
        g = jax.random.normal(k2, shape, dtype=jnp.float32)
        min_elems = 0 if force_kernel else MIN_PALLAS_ELEMENTS
        loss = jax.block_until_ready(
            mse_loss(p, g, min_pallas_elements=min_elems))
        ref = jnp.mean((p - g) ** 2)
        assert jnp.allclose(loss, ref, rtol=rtol, atol=1e-7), (shape, loss, ref)

    keys = jax.random.split(root, 3)
    # Small shape consistent with a generic regression target; forced through
    # the Pallas kernel so the kernel path is exercised.
    run_case(keys[0], (2, 4, 16, 16), force_kernel=True, rtol=1e-6)
    # Ragged, non-128-multiple element count (exercises in-kernel row masking
    # and the minimal pad-to-128 fallback).
    run_case(keys[1], (3, 5, 7, 11), force_kernel=True, rtol=1e-6)
    # Large enough to take the kernel path by default and span multiple tiles /
    # chunks (exercises multi-step accumulation + grid-rounding masking).
    run_case(keys[2], (4, 8, 160, 256), force_kernel=False, rtol=1e-4)

    print("KERNEL_OK")
</pallas_src>

<mosaic_0001>
module attributes {stable_mosaic.version = 11 : i64} {
  func.func @_mse_partial_kernel(%arg0: i32, %arg1: i32, %arg2: memref<16x128xf32, #tpu.memory_space<vmem>>, %arg3: memref<16x128xf32, #tpu.memory_space<vmem>>, %arg4: memref<1x8x128xf32, #tpu.memory_space<vmem>>) attributes {dimension_semantics = [#tpu.dimension_semantics<parallel>, #tpu.dimension_semantics<arbitrary>], iteration_bounds = array<i64: 1, 1>, scalar_prefetch = 0 : i64, scratch_operands = 0 : i64, tpu.core_type = #tpu.core_type<tc>, window_params = [{transform_indices = @transform_0, window_bounds = array<i64: 16, 128>}, {transform_indices = @transform_1, window_bounds = array<i64: 16, 128>}, {transform_indices = @transform_2, window_bounds = array<i64: 1, 8, 128>}]} {
    %c0_i32 = arith.constant 0 : i32
    %0 = arith.cmpi eq, %arg1, %c0_i32 : i32
    %1 = arith.extui %0 : i1 to i32
    %c0_i32_0 = arith.constant 0 : i32
    %2 = arith.cmpi ne, %1, %c0_i32_0 : i32
    scf.if %2 {
      %cst_10 = arith.constant 0.000000e+00 : f32
      %15 = vector.broadcast %cst_10 : f32 to vector<8x128xf32>
      %c0_11 = arith.constant 0 : index
      %c0_12 = arith.constant 0 : index
      %c0_13 = arith.constant 0 : index
      %16 = vector.load %arg4[%c0_11, %c0_12, %c0_13] : memref<1x8x128xf32, #tpu.memory_space<vmem>>, vector<1x8x128xf32>
      %17 = vector.shape_cast %16 : vector<1x8x128xf32> to vector<8x128xf32>
      %18 = vector.shape_cast %15 : vector<8x128xf32> to vector<1x8x128xf32>
      tpu.vector_store %arg4[%c0_11, %c0_12, %c0_13], %18 {strides = array<i32>} : memref<1x8x128xf32, #tpu.memory_space<vmem>>, vector<1x8x128xf32>,
    } else {
    }
    %c0 = arith.constant 0 : index
    %c0_1 = arith.constant 0 : index
    %3 = vector.load %arg2[%c0, %c0_1] : memref<16x128xf32, #tpu.memory_space<vmem>>, vector<16x128xf32>
    %c0_2 = arith.constant 0 : index
    %c0_3 = arith.constant 0 : index
    %4 = vector.load %arg3[%c0_2, %c0_3] : memref<16x128xf32, #tpu.memory_space<vmem>>, vector<16x128xf32>
    %5 = arith.subf %3, %4 : vector<16x128xf32>
    %6 = arith.mulf %5, %5 : vector<16x128xf32>
    %c0_4 = arith.constant 0 : index
    %c0_5 = arith.constant 0 : index
    %c0_6 = arith.constant 0 : index
    %7 = vector.load %arg4[%c0_4, %c0_5, %c0_6] : memref<1x8x128xf32, #tpu.memory_space<vmem>>, vector<1x8x128xf32>
    %8 = vector.shape_cast %7 : vector<1x8x128xf32> to vector<8x128xf32>
    %9 = vector.shape_cast %6 : vector<16x128xf32> to vector<2x8x128xf32>
    %cst = arith.constant dense<0.000000e+00> : vector<8x128xf32>
    %10 = vector.multi_reduction <add>, %9, %cst [0] : vector<2x8x128xf32> to vector<8x128xf32>
    %11 = arith.addf %8, %10 : vector<8x128xf32>
    %c0_7 = arith.constant 0 : index
    %c0_8 = arith.constant 0 : index
    %c0_9 = arith.constant 0 : index
    %12 = vector.load %arg4[%c0_7, %c0_8, %c0_9] : memref<1x8x128xf32, #tpu.memory_space<vmem>>, vector<1x8x128xf32>
    %13 = vector.shape_cast %12 : vector<1x8x128xf32> to vector<8x128xf32>
    %14 = vector.shape_cast %11 : vector<8x128xf32> to vector<1x8x128xf32>
    tpu.vector_store %arg4[%c0_7, %c0_8, %c0_9], %14 {strides = array<i32>} : memref<1x8x128xf32, #tpu.memory_space<vmem>>, vector<1x8x128xf32>,
    return
  }
  func.func @transform_0(%arg0: i32, %arg1: i32) -> (i32, i32) {
    %c1_i32 = arith.constant 1 : i32
    %0 = arith.muli %arg0, %c1_i32 : i32
    %1 = arith.addi %0, %arg1 : i32
    %c0_i32 = arith.constant 0 : i32
    %2 = arith.minsi %1, %c0_i32 : i32
    %c0_i32_0 = arith.constant 0 : i32
    %c0_i32_1 = arith.constant 0 : i32
    return %2, %c0_i32_0 : i32, i32
  }
  func.func @transform_1(%arg0: i32, %arg1: i32) -> (i32, i32) {
    %c1_i32 = arith.constant 1 : i32
    %0 = arith.muli %arg0, %c1_i32 : i32
    %1 = arith.addi %0, %arg1 : i32
    %c0_i32 = arith.constant 0 : i32
    %2 = arith.minsi %1, %c0_i32 : i32
    %c0_i32_0 = arith.constant 0 : i32
    %c0_i32_1 = arith.constant 0 : i32
    return %2, %c0_i32_0 : i32, i32
  }
  func.func @transform_2(%arg0: i32, %arg1: i32) -> (i32, i32, i32) {
    %c0_i32 = arith.constant 0 : i32
    %c0_i32_0 = arith.constant 0 : i32
    %c0_i32_1 = arith.constant 0 : i32
    return %arg0, %c0_i32, %c0_i32_0 : i32, i32, i32
  }
}

</mosaic_0001>

<bundles_post_ra>
// kernel: tpu_custom_call.1
= control target key start
LH: loop header
LB: loop body
LE: loop exit
PB: predicated region body
PF: predicated region fallthrough
CT: control target
= control target key end

     0   :  { %7 = vsyncpa [#allocation3], 0  ;;  %s216_s0 = inlined_call_operand.hbm [shape: f32[16,128], index: 0, kind: input, shape index: {}]   ;;  %s217_s1 = inlined_call_operand.hbm [shape: f32[16,128], index: 1, kind: input, shape index: {}]   ;;  %s218_s2 = inlined_call_operand.hbm [shape: f32[1,8,128], index: 2, kind: output, shape index: {}]  }
   0x1   :  { %8 = vsyncpa [#allocation6], 0 }
   0x2   :  { %9 = vsyncpa [#allocation4], 0  ;;  %s20_s11 = sshll.u32 %s216_s0, 4  ;;  %s187_s12 = smov [#allocation2]   ;;  %s21_s11 = int_to_ptr.hbm [resolvable:$true] %s20_s11 }
   0x3   :  { %s22_s13 = sshll.u32 %s187_s12, 4  ;;  %s39_s16 = sshll.u32 %s217_s1, 4  ;;  %s23_s13 = int_to_ptr.vmem [resolvable:$true] %s22_s13  ;;  %s40_s16 = int_to_ptr.hbm [resolvable:$true] %s39_s16 }
   0x4   :  { %s188_s17 = smov 128   ;;  %s189_s18 = smov 8  }
   0x5   :  { %28 = dma.hbm_to_vmem [thread:$0]  %s21_s11, 256, %s23_s13, [#allocation3], %s188_s17, %s188_s17, %s189_s18  }
   0x6   :  { %s190_s19 = smov [#allocation5]  }
   0x7   :  { %s41_s20 = sshll.u32 %s190_s19, 4  ;;  %s42_s20 = int_to_ptr.vmem [resolvable:$true] %s41_s20 }
   0x8   :  { %47 = dma.hbm_to_vmem [thread:$0]  %s40_s16, 256, %s42_s20, [#allocation6], %s188_s17, %s188_s17, %s189_s18  }
   0x9   :  { %181 = dma.done.wait [#allocation3], 256  }
   0xa   :  { %182 = vsyncadd [#allocation3], 4294967040 }
   0xb   :  { %183 = dma.done.wait [#allocation6], 256  }
   0xc   :  { %184 = vsyncadd [#allocation6], 4294967040  ;;  %v69_v0 = vld [vmem:[#allocation2] sm:$0xff]  ;;  %v70_v1 = vld [vmem:[#allocation2 + $0x8] sm:$0xff]  ;;  %s191_s0 = smov [#allocation7]   ;;  %s88_s23 = sshll.u32 %s218_s2, 4  ;;  %s89_s23 = int_to_ptr.hbm [resolvable:$true] %s88_s23 }
   0xd   :  { %v71_v2 = vld [vmem:[#allocation5] sm:$0xff]  ;;  %v72_v3 = vld [vmem:[#allocation5 + $0x8] sm:$0xff]  ;;  %s86_s1 = sshll.u32 %s191_s0, 4  ;;  %s87_s1 = int_to_ptr.vmem [resolvable:$true] %s86_s1 }
   0xe   :  { %v73_v4 = vsub.f32 %v69_v0, %v71_v2  ;;  %v74_v5 = vsub.f32 %v70_v1, %v72_v3 }
  0x10   :  { %v75_v6 = vmul.f32 %v73_v4, %v73_v4  ;;  %v76_v7 = vmul.f32 %v74_v5, %v74_v5 }
  0x12   :  { %v78_v8 = vadd.f32 %v76_v7, %v75_v6 }
  0x14   :  { %80 = vst [vmem:[#allocation7] sm:$0xff] %v78_v8 }
  0x15   :  { %91 = dma.vmem_to_hbm [thread:$0]  %s87_s1, 128, %s89_s23, [#allocation4]  }
  0x16   :  { %185 = dma.done.wait [#allocation4], 128  }
  0x17   :  { %186 = vsyncadd [#allocation4], 4294967168 }
  0x18   :  { %96 = vsyncpa [#allocation3], 1 }
  0x19   :  { %97 = vsyncpa [#allocation6], 1 }
  0x1a   :  { %98 = vsyncpa [#allocation4], 1 }

</bundles_post_ra>
